<compile_context>
chip_gen: v7x
topology: tpu7x:2x2x1
jax: 0.10.0
libtpu: 0.0.40
codegen_flags: <defaults>
</compile_context>

<pallas_src>
import jax
import jax.numpy as jnp
from jax.experimental import pallas as pl
from jax.experimental.pallas import tpu as pltpu

_LANES = 128
# (2048, 128) f32 = 1 MiB per block; 4 streams x 2 buffers = ~8 MiB VMEM.
# Good roofline fraction on v5e/v6e/v7x and inside v5e's 16 MiB scoped default.
_MAX_TILE_ROWS = 2048


def _round_up(x, m):
    return ((x + m - 1) // m) * m


def _model_kernel(gen_map_ref, cd_ref, gen_ref, clock_ref, tdp_ref, out_ref):
    # gen_map_ref : (G,)      float32  SMEM
    # cd_ref      : (2,)      float32  SMEM  -> [c, d]
    # gen_ref     : (tm, 128) int32    VMEM
    # clock_ref   : (tm, 128) float32  VMEM
    # tdp_ref     : (tm, 128) float32  VMEM
    # out_ref     : (tm, 128) float32  VMEM
    c = cd_ref[0]
    d = cd_ref[1]
    gen = gen_ref[...]
    acc = c * clock_ref[...] + d * tdp_ref[...]
    # Per-lane select chain == gather(gen_map, gen); out-of-range / padded
    # gen contributes 0 (matches one_hot semantics).  Free VPU filler for
    # small G; switch to a VMEM lookup table (jnp.take) if G grows beyond ~32.
    for g in range(gen_map_ref.shape[0]):
        acc += jnp.where(gen == g, gen_map_ref[g], 0.0)
    out_ref[...] = acc


def model_forward(x_gen, x_ix, x_max_clock_speed, x_max_tdp, gen_map, b, c, d):
    # x_ix and b are unused by the reference forward pass (kept for signature parity).
    del x_ix, b
    N = x_gen.shape[0]

    # Lane-dense (rows, 128) layout: pad only up to the next 128 multiple.
    rows = pl.cdiv(N, _LANES)
    padded_n = rows * _LANES

    def to2d(v, fill):
        if padded_n != N:
            v = jnp.pad(v, (0, padded_n - N), constant_values=fill)
        return v.reshape(rows, _LANES)

    # TODO(synk): if the caller already stores x_gen as int8, feed it through
    # at that width (sublane tile multiple of 32) to cut gen HBM traffic.
    gen2 = to2d(x_gen.astype(jnp.int32), -1)              # -1 -> contributes 0
    clock2 = to2d(x_max_clock_speed.astype(jnp.float32), 0.0)
    tdp2 = to2d(x_max_tdp.astype(jnp.float32), 0.0)

    gen_map_s = gen_map.astype(jnp.float32)
    cd = jnp.stack([jnp.asarray(c, jnp.float32), jnp.asarray(d, jnp.float32)])

    # Row-tile size: large blocks amortize per-grid-step overhead; ensure >=2
    # grid steps when there is enough work so v7x's 2 TensorCores both engage.
    tm = min(_MAX_TILE_ROWS, _round_up(rows, 8))
    if rows > 8 and pl.cdiv(rows, tm) < 2:
        tm = _round_up(pl.cdiv(rows, 2), 8)
    grid = (pl.cdiv(rows, tm),)

    G = int(gen_map_s.shape[0])
    cost = pl.CostEstimate(
        flops=int(N) * (4 + 3 * G),
        transcendentals=0,
        bytes_accessed=int(N) * 16 + G * 4 + 8,
    )

    out = pl.pallas_call(
        _model_kernel,
        out_shape=jax.ShapeDtypeStruct((rows, _LANES), jnp.float32),
        grid=grid,
        in_specs=[
            pl.BlockSpec(memory_space=pltpu.MemorySpace.SMEM),   # gen_map
            pl.BlockSpec(memory_space=pltpu.MemorySpace.SMEM),   # [c, d]
            pl.BlockSpec((tm, _LANES), lambda i: (i, 0)),        # x_gen
            pl.BlockSpec((tm, _LANES), lambda i: (i, 0)),        # clock
            pl.BlockSpec((tm, _LANES), lambda i: (i, 0)),        # tdp
        ],
        out_specs=pl.BlockSpec((tm, _LANES), lambda i: (i, 0)),
        compiler_params=pltpu.CompilerParams(
            dimension_semantics=("parallel",),
            vmem_limit_bytes=32 * 1024 * 1024,
        ),
        cost_estimate=cost,
    )(gen_map_s, cd, gen2, clock2, tdp2)

    out = out.reshape(padded_n)
    return out if padded_n == N else out[:N]


if __name__ == "__main__":
    key = jax.random.PRNGKey(0)
    k_gm, k_b, k_c, k_d, k_gen, k_ix, k_clk, k_tdp = jax.random.split(key, 8)

    num_gens = 4
    N = 300  # small batch; non-multiple of 128 to exercise the ragged tail

    # Deterministic "randn"-style parameters (mirrors torch.nn.Parameter(torch.randn(...))).
    gen_map = jax.random.normal(k_gm, (num_gens,), dtype=jnp.float32)
    b = jax.random.normal(k_b, (), dtype=jnp.float32)   # unused in forward
    c = jax.random.normal(k_c, (), dtype=jnp.float32)
    d = jax.random.normal(k_d, (), dtype=jnp.float32)

    # Inputs.
    x_gen = jax.random.randint(k_gen, (N,), 0, num_gens, dtype=jnp.int32)
    x_ix = jax.random.randint(k_ix, (N,), 0, 100, dtype=jnp.int32)  # unused
    x_max_clock_speed = jax.random.normal(k_clk, (N,), dtype=jnp.float32)
    x_max_tdp = jax.random.normal(k_tdp, (N,), dtype=jnp.float32)

    out = model_forward(x_gen, x_ix, x_max_clock_speed, x_max_tdp, gen_map, b, c, d)
    out = jax.block_until_ready(out)

    # Pure-JAX reference for correctness.
    onehot = jax.nn.one_hot(x_gen, num_gens, dtype=jnp.float32)
    ref = jnp.sum(onehot * gen_map, axis=1) + c * x_max_clock_speed + d * x_max_tdp
    assert out.shape == (N,) and out.dtype == jnp.float32
    assert jnp.allclose(out, ref, atol=1e-5, rtol=1e-5)

    print("KERNEL_OK")
</pallas_src>

<mosaic_0001>
module attributes {stable_mosaic.version = 11 : i64} {
  func.func @_model_kernel(%arg0: i32, %arg1: memref<4xf32, #tpu.memory_space<smem>>, %arg2: memref<2xf32, #tpu.memory_space<smem>>, %arg3: memref<8x128xi32, #tpu.memory_space<vmem>>, %arg4: memref<8x128xf32, #tpu.memory_space<vmem>>, %arg5: memref<8x128xf32, #tpu.memory_space<vmem>>, %arg6: memref<8x128xf32, #tpu.memory_space<vmem>>) attributes {dimension_semantics = [#tpu.dimension_semantics<parallel>], iteration_bounds = array<i64: 1>, scalar_prefetch = 0 : i64, scratch_operands = 0 : i64, tpu.core_type = #tpu.core_type<tc>, window_params = [{transform_indices = @transform_0, window_bounds = array<i64: 4>}, {transform_indices = @transform_1, window_bounds = array<i64: 2>}, {transform_indices = @transform_2, window_bounds = array<i64: 8, 128>}, {transform_indices = @transform_3, window_bounds = array<i64: 8, 128>}, {transform_indices = @transform_4, window_bounds = array<i64: 8, 128>}, {transform_indices = @transform_5, window_bounds = array<i64: 8, 128>}]} {
    %c0 = arith.constant 0 : index
    %0 = memref.load %arg2[%c0] : memref<2xf32, #tpu.memory_space<smem>>
    %c1 = arith.constant 1 : index
    %1 = memref.load %arg2[%c1] : memref<2xf32, #tpu.memory_space<smem>>
    %c0_0 = arith.constant 0 : index
    %c0_1 = arith.constant 0 : index
    %2 = vector.load %arg3[%c0_0, %c0_1] : memref<8x128xi32, #tpu.memory_space<vmem>>, vector<8x128xi32>
    %c0_2 = arith.constant 0 : index
    %c0_3 = arith.constant 0 : index
    %3 = vector.load %arg4[%c0_2, %c0_3] : memref<8x128xf32, #tpu.memory_space<vmem>>, vector<8x128xf32>
    %4 = vector.broadcast %0 : f32 to vector<8x128xf32>
    %5 = arith.mulf %4, %3 : vector<8x128xf32>
    %c0_4 = arith.constant 0 : index
    %c0_5 = arith.constant 0 : index
    %6 = vector.load %arg5[%c0_4, %c0_5] : memref<8x128xf32, #tpu.memory_space<vmem>>, vector<8x128xf32>
    %7 = vector.broadcast %1 : f32 to vector<8x128xf32>
    %8 = arith.mulf %7, %6 : vector<8x128xf32>
    %9 = arith.addf %5, %8 : vector<8x128xf32>
    %c0_i32 = arith.constant 0 : i32
    %10 = vector.broadcast %c0_i32 : i32 to vector<8x128xi32>
    %11 = arith.cmpi eq, %2, %10 : vector<8x128xi32>
    %c0_6 = arith.constant 0 : index
    %12 = memref.load %arg1[%c0_6] : memref<4xf32, #tpu.memory_space<smem>>
    %cst = arith.constant 0.000000e+00 : f32
    %13 = vector.broadcast %12 : f32 to vector<8x128xf32>
    %14 = vector.broadcast %cst : f32 to vector<8x128xf32>
    %15 = arith.select %11, %13, %14 : vector<8x128xi1>, vector<8x128xf32>
    %16 = arith.addf %9, %15 : vector<8x128xf32>
    %c1_i32 = arith.constant 1 : i32
    %17 = vector.broadcast %c1_i32 : i32 to vector<8x128xi32>
    %18 = arith.cmpi eq, %2, %17 : vector<8x128xi32>
    %c1_7 = arith.constant 1 : index
    %19 = memref.load %arg1[%c1_7] : memref<4xf32, #tpu.memory_space<smem>>
    %cst_8 = arith.constant 0.000000e+00 : f32
    %20 = vector.broadcast %19 : f32 to vector<8x128xf32>
    %21 = vector.broadcast %cst_8 : f32 to vector<8x128xf32>
    %22 = arith.select %18, %20, %21 : vector<8x128xi1>, vector<8x128xf32>
    %23 = arith.addf %16, %22 : vector<8x128xf32>
    %c2_i32 = arith.constant 2 : i32
    %24 = vector.broadcast %c2_i32 : i32 to vector<8x128xi32>
    %25 = arith.cmpi eq, %2, %24 : vector<8x128xi32>
    %c2 = arith.constant 2 : index
    %26 = memref.load %arg1[%c2] : memref<4xf32, #tpu.memory_space<smem>>
    %cst_9 = arith.constant 0.000000e+00 : f32
    %27 = vector.broadcast %26 : f32 to vector<8x128xf32>
    %28 = vector.broadcast %cst_9 : f32 to vector<8x128xf32>
    %29 = arith.select %25, %27, %28 : vector<8x128xi1>, vector<8x128xf32>
    %30 = arith.addf %23, %29 : vector<8x128xf32>
    %c3_i32 = arith.constant 3 : i32
    %31 = vector.broadcast %c3_i32 : i32 to vector<8x128xi32>
    %32 = arith.cmpi eq, %2, %31 : vector<8x128xi32>
    %c3 = arith.constant 3 : index
    %33 = memref.load %arg1[%c3] : memref<4xf32, #tpu.memory_space<smem>>
    %cst_10 = arith.constant 0.000000e+00 : f32
    %34 = vector.broadcast %33 : f32 to vector<8x128xf32>
    %35 = vector.broadcast %cst_10 : f32 to vector<8x128xf32>
    %36 = arith.select %32, %34, %35 : vector<8x128xi1>, vector<8x128xf32>
    %37 = arith.addf %30, %36 : vector<8x128xf32>
    %c0_11 = arith.constant 0 : index
    %c0_12 = arith.constant 0 : index
    %38 = vector.load %arg6[%c0_11, %c0_12] : memref<8x128xf32, #tpu.memory_space<vmem>>, vector<8x128xf32>
    tpu.vector_store %arg6[%c0_11, %c0_12], %37 {strides = array<i32>} : memref<8x128xf32, #tpu.memory_space<vmem>>, vector<8x128xf32>,
    return
  }
  func.func @transform_0(%arg0: i32) -> i32 {
    %c0_i32 = arith.constant 0 : i32
    %c0_i32_0 = arith.constant 0 : i32
    return %c0_i32 : i32
  }
  func.func @transform_1(%arg0: i32) -> i32 {
    %c0_i32 = arith.constant 0 : i32
    %c0_i32_0 = arith.constant 0 : i32
    return %c0_i32 : i32
  }
  func.func @transform_2(%arg0: i32) -> (i32, i32) {
    %c0_i32 = arith.constant 0 : i32
    %c0_i32_0 = arith.constant 0 : i32
    return %arg0, %c0_i32 : i32, i32
  }
  func.func @transform_3(%arg0: i32) -> (i32, i32) {
    %c0_i32 = arith.constant 0 : i32
    %c0_i32_0 = arith.constant 0 : i32
    return %arg0, %c0_i32 : i32, i32
  }
  func.func @transform_4(%arg0: i32) -> (i32, i32) {
    %c0_i32 = arith.constant 0 : i32
    %c0_i32_0 = arith.constant 0 : i32
    return %arg0, %c0_i32 : i32, i32
  }
  func.func @transform_5(%arg0: i32) -> (i32, i32) {
    %c0_i32 = arith.constant 0 : i32
    %c0_i32_0 = arith.constant 0 : i32
    return %arg0, %c0_i32 : i32, i32
  }
}

</mosaic_0001>

<bundles_post_ra>
// kernel: tpu_custom_call.1
= control target key start
LH: loop header
LB: loop body
LE: loop exit
PB: predicated region body
PF: predicated region fallthrough
CT: control target
= control target key end

     0   :  { %10 = vsyncpa [#allocation4], 0  ;;  %s223_s0 = inlined_call_operand.hbm [shape: f32[4], index: 0, kind: input, shape index: {}]   ;;  %s224_s1 = inlined_call_operand.vmem [shape: f32[2], index: 1, kind: input, shape index: {}]   ;;  %s225_s2 = inlined_call_operand.vmem [shape: s32[3,128], index: 2, kind: input, shape index: {}]   ;;  %s226_s3 = inlined_call_operand.vmem [shape: f32[3,128], index: 3, kind: input, shape index: {}]   ;;  %s227_s4 = inlined_call_operand.vmem [shape: f32[3,128], index: 4, kind: input, shape index: {}]   ;;  %s228_s5 = inlined_call_operand.hbm [shape: f32[3,128], index: 5, kind: output, shape index: {}]  }
   0x1   :  { %11 = vsyncpa [#allocation5], 0 }
   0x2   :  { %12 = vsyncpa [#allocation3], 0  ;;  %s27_s20 = sshll.u32 %s224_s1, 4  ;;  %s102_s23 = scalar_lea.hbm %s223_s0, 16  ;;  %s28_s20 = int_to_ptr.vmem [resolvable:$true] %s27_s20 }
   0x3   :  { %p103_p0 = scmp.ne.s32.totalorder %s223_s0, %s102_s23  ;;  %p106_p1 = scmp.lt.u32.totalorder %s102_s23, %s223_s0 }
   0x5   :  { %p108_p2 = pnand %p106_p1, %p103_p0 }
   0x7   :  { %111 = shalt.err (!%p108_p2)
}
   0x8   :  { %s152_s28 = smov [#allocation2]   ;;  %s112_s1 = scalar_lea.vmem %s28_s20, 16 }
   0x9   :  { %20 = dma.hbm_to_smem %s223_s0, 16, %s152_s28, [#allocation4]  }
   0xa   :  { %p113_p3 = scmp.ne.s32.totalorder %s28_s20, %s112_s1  ;;  %p117_p4 = scmp.lt.s32.totalorder %s28_s20, %s28_s20 }
   0xb   :  { %p118_p5 = scmp.lt.s32.totalorder %s112_s1, %s112_s1 }
   0xd   :  { %p119_p6 = por %p118_p5, %p117_p4 }
   0xf   :  { %p120_p7 = pnand %p119_p6, %p113_p3 }
  0x11   :  { %123 = shalt.err (!%p120_p7)
}
  0x12   :  { %s153_s6 = smov [#allocation6]  }
  0x13   :  { %30 = dma.vmem_to_smem %s28_s20, 16, %s153_s6, [#allocation5]  }
  0x14   :  { %146 = dma.done.wait [#allocation4], 16  }
  0x15   :  { %147 = vsyncadd [#allocation4], 4294967280 }
  0x16   :  { %148 = dma.done.wait [#allocation5], 16  }
  0x17   :  { %149 = vsyncadd [#allocation5], 4294967280 }
  0x18   :  { %43 = sfence }
  0x19   :  { %s44_s7 = sld [smem:[#allocation6]]  ;;  %s93_s8 = sld [smem:[#allocation6 + $0x1]]  ;;  %v46_v0 = vld [vmem:[%s225_s2] sm:$0xff] }
  0x1a   :  { %s55_s9 = sld [smem:[#allocation2]]  ;;  %s94_s11 = sld [smem:[#allocation2 + $0x1]]  ;;  %v47_v1 = vld [vmem:[%s226_s3] sm:$0xff]  ;;  %vm54_vm0 = vcmp.eq.s32.totalorder %v46_v0, 0  ;;  %vm59_vm1 = vcmp.eq.s32.totalorder %v46_v0, 1  ;;  %vm64_vm2 = vcmp.eq.s32.totalorder %v46_v0, 2 }
  0x1b   :  { %s95_s12 = sld [smem:[#allocation2 + $0x2]]  ;;  %s96_s13 = sld [smem:[#allocation2 + $0x3]]  ;;  %v50_v2 = vld [vmem:[%s227_s4] sm:$0xff]  ;;  %vm69_vm3 = vcmp.eq.s32.totalorder %v46_v0, 3 }
  0x1f   :  { %v48_v3 = vstv %s44_s7  ;;  %v51_v4 = vstv %s93_s8 }
  0x20   :  { %v49_v5 = vmul.f32 %v48_v3, %v47_v1  ;;  %v52_v6 = vmul.f32 %v51_v4, %v50_v2  ;;  %v56_v7 = vstv %s55_s9  ;;  %v61_v9 = vstv %s94_s11 }
  0x21   :  { %v57_v8 = vsel %vm54_vm0, %v56_v7, 0.0  ;;  %v66_v11 = vstv %s95_s12  ;;  %v62_v12 = vsel %vm59_vm1, %v61_v9, 0.0  ;;  %v71_v14 = vstv %s96_s13 }
  0x22   :  { %v53_v10 = vadd.f32 %v52_v6, %v49_v5  ;;  %v67_v15 = vsel %vm64_vm2, %v66_v11, 0.0  ;;  %v72_v17 = vsel %vm69_vm3, %v71_v14, 0.0 }
  0x24   :  { %v58_v13 = vadd.f32 %v57_v8, %v53_v10 }
  0x26   :  { %v63_v16 = vadd.f32 %v62_v12, %v58_v13 }
  0x28   :  { %v68_v18 = vadd.f32 %v67_v15, %v63_v16 }
  0x2a   :  { %v73_v19 = vadd.f32 %v72_v17, %v68_v18 }
  0x2c   :  { %74 = vst [vmem:[#allocation7] sm:$0xff] %v73_v19 }
  0x2d   :  { %79 = vsyncadd [#allocation3], 64  ;;  %s154_s2 = smov [#allocation7]  }
  0x2e   :  { %s80_s3 = sshll.u32 %s154_s2, 4  ;;  %s81_s3 = int_to_ptr.vmem [resolvable:$true] %s80_s3 }
  0x2f   :  { %s124_s4 = scalar_lea.vmem %s81_s3, 64  ;;  %s128_s18 = scalar_lea.vmem %s81_s3, 128 }
  0x30   :  { %p125_p8 = scmp.ne.s32.totalorder %s81_s3, %s124_s4  ;;  %p129_p9 = scmp.lt.s32.totalorder %s81_s3, %s81_s3 }
  0x31   :  { %p130_p10 = scmp.lt.s32.totalorder %s128_s18, %s124_s4 }
  0x33   :  { %p131_p11 = por %p130_p10, %p129_p9 }
  0x35   :  { %p132_p12 = pnand %p131_p11, %p125_p8 }
  0x37   :  { %135 = shalt.err (!%p132_p12)
}
  0x38   :  { %s136_s21 = scalar_lea.hbm %s228_s5, 64 }
  0x39   :  { %p137_p13 = scmp.ne.s32.totalorder %s228_s5, %s136_s21  ;;  %p140_p0 = scmp.lt.u32.totalorder %s136_s21, %s228_s5 }
  0x3b   :  { %p142_p1 = pnand %p140_p0, %p137_p13 }
  0x3d   :  { %145 = shalt.err (!%p142_p1)
}
  0x3e   :  { %s155_s26 = smov 64   ;;  %s156_s27 = smov 4  }
  0x3f   :  { %86 = dma.vmem_to_hbm [thread:$0]  %s81_s3, 64, %s228_s5, [#allocation3], %s155_s26, %s155_s26, %s156_s27  }
  0x40   :  { %150 = dma.done.wait [#allocation3], 128  }
  0x41   :  { %151 = vsyncadd [#allocation3], 4294967168 }
  0x42   :  { %90 = vsyncpa [#allocation3], 1 }
  0x43   :  { %91 = vsyncpa [#allocation4], 1 }
  0x44   :  { %92 = vsyncpa [#allocation5], 1 }

</bundles_post_ra>
